<compile_context>
chip_gen: v5e
topology: v5e:2x2
jax: 0.10.0
libtpu: 0.0.40
codegen_flags: <defaults>
</compile_context>

<pallas_src>
import jax
import jax.numpy as jnp
from jax.experimental import pallas as pl
from jax.experimental.pallas import tpu as pltpu


def _affine_kernel(b0_ref, b1_ref, x_ref, o_ref):
    # b0_ref, b1_ref : SMEM (1, 1) f32 scalars
    # x_ref, o_ref   : VMEM tiles, either (tile_rows, 128) or (tile_elems,)
    x = x_ref[...]
    b0 = b0_ref[0, 0].astype(x.dtype)
    b1 = b1_ref[0, 0].astype(x.dtype)
    o_ref[...] = b0 + b1 * x


def _round_up(v, m):
    return ((v + m - 1) // m) * m


def _default_block_bytes():
    """~4 MiB tiles on v6e/v7x (16 MiB double-buffered in+out fits their
    32 MiB scoped-VMEM default); 2 MiB on v5e and older (16 MiB default)."""
    try:
        kind = jax.devices()[0].device_kind.lower()
    except Exception:
        return 2 * 1024 * 1024
    for old in ("v2", "v3", "v4", "v5"):
        if old in kind:
            return 2 * 1024 * 1024
    return 4 * 1024 * 1024


def scalar_affine(x, b0, b1, *, block_bytes=None, min_kernel_elems=1 << 16):
    """Computes b0 + b1 * x with the streaming hot path in a Pallas kernel."""
    orig_shape = x.shape
    n = x.size
    if n == 0:
        return x

    b0 = jnp.asarray(b0, dtype=jnp.float32)
    b1 = jnp.asarray(b1, dtype=jnp.float32)

    # Small-input fast path: kernel launch + fixed overhead dominates there.
    if n < min_kernel_elems:
        return (b0.astype(x.dtype) + b1.astype(x.dtype) * x).astype(x.dtype)

    if block_bytes is None:
        block_bytes = _default_block_bytes()

    lanes = 128
    itemsize = jnp.dtype(x.dtype).itemsize
    # Dtype-aware sublane granularity: f32 -> 8, bf16/f16 -> 16, int8/fp8 -> 32.
    sub = 8 * max(1, 4 // itemsize)

    b0_arr = b0.reshape(1, 1)
    b1_arr = b1.reshape(1, 1)

    common = dict(
        compiler_params=pltpu.CompilerParams(
            dimension_semantics=("parallel",),
        ),
        cost_estimate=pl.CostEstimate(
            flops=2 * n,
            transcendentals=0,
            bytes_accessed=2 * n * itemsize,
        ),
    )

    if n % lanes == 0:
        # Aligned: pure metadata reshape (contiguous NCHW -> (rows, 128)).
        rows = n // lanes
        x2 = x.reshape(rows, lanes)

        rows_rounded = _round_up(rows, sub)
        tile_rows = max(sub, (block_bytes // (lanes * itemsize)) // sub * sub)
        tile_rows = min(tile_rows, rows_rounded)
        # Keep >=2 grid steps so both v7x TensorCores stream (when rows allow).
        if rows_rounded > sub and tile_rows >= rows:
            tile_rows = _round_up(-(-rows // 2), sub)

        grid = (pl.cdiv(rows, tile_rows),)  # partial last block masked by Pallas

        out = pl.pallas_call(
            _affine_kernel,
            out_shape=jax.ShapeDtypeStruct((rows, lanes), x2.dtype),
            grid_spec=pltpu.PrefetchScalarGridSpec(
                num_scalar_prefetch=0,
                grid=grid,
                in_specs=[
                    pl.BlockSpec(memory_space=pltpu.SMEM),   # b0 (whole array)
                    pl.BlockSpec(memory_space=pltpu.SMEM),   # b1 (whole array)
                    pl.BlockSpec((tile_rows, lanes), lambda i: (i, 0)),
                ],
                out_specs=pl.BlockSpec((tile_rows, lanes), lambda i: (i, 0)),
            ),
            **common,
        )(b0_arr, b1_arr, x2)
        return out.reshape(orig_shape)

    # Ragged (n % 128 != 0): flat 1-D view (metadata only); Pallas masks the
    # partial last block.  No pad, no trailing slice -> no extra HBM passes.
    x1 = x.reshape(-1)
    blk = sub * lanes                       # 1-D block granularity (8,128)-safe
    n_rounded = _round_up(n, blk)
    tile_elems = max(blk, (block_bytes // itemsize) // blk * blk)
    tile_elems = min(tile_elems, n_rounded)
    if n_rounded > blk and tile_elems >= n:
        tile_elems = _round_up(-(-n // 2), blk)

    grid = (pl.cdiv(n, tile_elems),)

    out = pl.pallas_call(
        _affine_kernel,
        out_shape=jax.ShapeDtypeStruct((n,), x1.dtype),
        grid_spec=pltpu.PrefetchScalarGridSpec(
            num_scalar_prefetch=0,
            grid=grid,
            in_specs=[
                pl.BlockSpec(memory_space=pltpu.SMEM),       # b0
                pl.BlockSpec(memory_space=pltpu.SMEM),       # b1
                pl.BlockSpec((tile_elems,), lambda i: (i,)),
            ],
            out_specs=pl.BlockSpec((tile_elems,), lambda i: (i,)),
        ),
        **common,
    )(b0_arr, b1_arr, x1)
    return out.reshape(orig_shape)


if __name__ == "__main__":
    key = jax.random.PRNGKey(0)
    k_x, k_b0, k_b1, k_xr = jax.random.split(key, 4)

    # Scalar parameters (matching torch.randn(())) and a small NCHW input.
    b0 = jax.random.normal(k_b0, (), dtype=jnp.float32)
    b1 = jax.random.normal(k_b1, (), dtype=jnp.float32)
    x = jax.random.normal(k_x, (2, 4, 16, 16), dtype=jnp.float32)

    y_ref = b0 + b1 * x

    # Force the Pallas kernel path (aligned 2-D path, >=2 parallel grid steps).
    y_kernel = jax.block_until_ready(scalar_affine(x, b0, b1, min_kernel_elems=0))
    assert y_kernel.shape == x.shape and y_kernel.dtype == x.dtype
    assert jnp.allclose(y_kernel, y_ref, atol=1e-6, rtol=1e-6)

    # Default path (small-input fast path) must agree as well.
    y_fast = jax.block_until_ready(scalar_affine(x, b0, b1))
    assert jnp.allclose(y_fast, y_ref, atol=1e-6, rtol=1e-6)

    # Ragged size (x.size % 128 != 0) exercises the pad-free flat 1-D path.
    xr = jax.random.normal(k_xr, (7, 13, 129), dtype=jnp.float32)
    yr_ref = b0 + b1 * xr
    yr = jax.block_until_ready(scalar_affine(xr, b0, b1, min_kernel_elems=0))
    assert yr.shape == xr.shape
    assert jnp.allclose(yr, yr_ref, atol=1e-6, rtol=1e-6)

    print("KERNEL_OK")
</pallas_src>

<mosaic_0001>
module attributes {stable_mosaic.version = 11 : i64} {
  func.func @_affine_kernel(%arg0: i32, %arg1: memref<1x1xf32, #tpu.memory_space<smem>>, %arg2: memref<1x1xf32, #tpu.memory_space<smem>>, %arg3: memref<8x128xf32, #tpu.memory_space<vmem>>, %arg4: memref<8x128xf32, #tpu.memory_space<vmem>>) attributes {dimension_semantics = [#tpu.dimension_semantics<parallel>], iteration_bounds = array<i64: 2>, scalar_prefetch = 0 : i64, scratch_operands = 0 : i64, tpu.core_type = #tpu.core_type<tc>, window_params = [{transform_indices = @transform_0, window_bounds = array<i64: 1, 1>}, {transform_indices = @transform_1, window_bounds = array<i64: 1, 1>}, {transform_indices = @transform_2, window_bounds = array<i64: 8, 128>}, {transform_indices = @transform_3, window_bounds = array<i64: 8, 128>}]} {
    %c0 = arith.constant 0 : index
    %c0_0 = arith.constant 0 : index
    %0 = vector.load %arg3[%c0, %c0_0] : memref<8x128xf32, #tpu.memory_space<vmem>>, vector<8x128xf32>
    %c0_1 = arith.constant 0 : index
    %c0_2 = arith.constant 0 : index
    %1 = memref.load %arg1[%c0_1, %c0_2] : memref<1x1xf32, #tpu.memory_space<smem>>
    %c0_3 = arith.constant 0 : index
    %c0_4 = arith.constant 0 : index
    %2 = memref.load %arg2[%c0_3, %c0_4] : memref<1x1xf32, #tpu.memory_space<smem>>
    %3 = vector.broadcast %2 : f32 to vector<8x128xf32>
    %4 = arith.mulf %3, %0 : vector<8x128xf32>
    %5 = vector.broadcast %1 : f32 to vector<8x128xf32>
    %6 = arith.addf %5, %4 : vector<8x128xf32>
    %c0_5 = arith.constant 0 : index
    %c0_6 = arith.constant 0 : index
    %7 = vector.load %arg4[%c0_5, %c0_6] : memref<8x128xf32, #tpu.memory_space<vmem>>, vector<8x128xf32>
    tpu.vector_store %arg4[%c0_5, %c0_6], %6 {strides = array<i32>} : memref<8x128xf32, #tpu.memory_space<vmem>>, vector<8x128xf32>,
    return
  }
  func.func @transform_0(%arg0: i32) -> (i32, i32) {
    %c0_i32 = arith.constant 0 : i32
    %c0_i32_0 = arith.constant 0 : i32
    %c0_i32_1 = arith.constant 0 : i32
    return %c0_i32, %c0_i32_0 : i32, i32
  }
  func.func @transform_1(%arg0: i32) -> (i32, i32) {
    %c0_i32 = arith.constant 0 : i32
    %c0_i32_0 = arith.constant 0 : i32
    %c0_i32_1 = arith.constant 0 : i32
    return %c0_i32, %c0_i32_0 : i32, i32
  }
  func.func @transform_2(%arg0: i32) -> (i32, i32) {
    %c0_i32 = arith.constant 0 : i32
    %c0_i32_0 = arith.constant 0 : i32
    return %arg0, %c0_i32 : i32, i32
  }
  func.func @transform_3(%arg0: i32) -> (i32, i32) {
    %c0_i32 = arith.constant 0 : i32
    %c0_i32_0 = arith.constant 0 : i32
    return %arg0, %c0_i32 : i32, i32
  }
}

</mosaic_0001>

<bundles_post_ra>
// kernel: tpu_custom_call.1
= control target key start
LH: loop header
LB: loop body
LE: loop exit
PB: predicated region body
PF: predicated region fallthrough
CT: control target
= control target key end

     0   :  { %s593_s0 = inlined_call_operand.<no memory space> [shape: f32[1,1], index: 0, kind: input, shape index: {}]   ;;  %s594_s1 = inlined_call_operand.<no memory space> [shape: f32[1,1], index: 1, kind: input, shape index: {}]   ;;  %s595_s2 = inlined_call_operand.hbm [shape: f32[16,128], index: 2, kind: input, shape index: {}]   ;;  %s596_s3 = inlined_call_operand.hbm [shape: f32[16,128], index: 3, kind: output, shape index: {}]  }
   0x1   :  { %8 = sst [smem:[#allocation2]] %s593_s0 }
   0x2   :  { %9 = sst [smem:[#allocation3]] %s594_s1 }
   0x3   :  { %10 = vsyncpa [#allocation5], 0 }
   0x4   :  { %12 = vsyncpa [#allocation5 + $0x1], 0 }
   0x5   :  { %13 = vsyncpa [#allocation6], 0 }
   0x6   :  { %15 = vsyncpa [#allocation6 + $0x1], 0  ;;  %s466_s16 = smov 0   ;;  %s468_s17 = smov 0  }
   0x7   :  { %s470_s18 = smov 0   ;;  %s472_s19 = smov 0  }
   0x8 LB: > { %s487_s0 = sadd.s32 4294967295, %s438_s19   ;;  %s284_s1 = sadd.s32 4294967294, %s438_s19   ;;  %s438_s19 = sphi %s472_s19, %s606_s19   ;;  %s434_s18 = sphi %s470_s18, %s605_s18   ;;  %s430_s17 = sphi %s468_s17, %s604_s17   ;;  %s426_s16 = sphi %s466_s16, %s603_s16  }
   0x9   : > { %s491_s20 = sadd.s32 1, %s438_s19   ;;  %s70_s21 = sadd.s32 1, %s434_s18 }
   0xa   : > { %s67_s22 = ssub.s32 %s438_s19, %s491_s20  ;;  %p77_p0 = scmp.ne.s32.totalorder %s434_s18, %s430_s17 }
   0xb   : > { %p68_p1 = scmp.eq.s32.totalorder %s67_s22, 0  ;;  %p78_p2 = scmp.eq.s32.totalorder %s438_s19, 0 }
   0xc   : > { %p83_p3 = scmp.ne.s32.totalorder %s430_s17, %s426_s16  ;;  %p84_p4 = scmp.eq.s32.totalorder %s487_s0, 0 }
   0xd   : > { %s503_s23 = scalar_select %p68_p1, %s434_s18, %s70_s21  }
   0xe   : > { %p505_p5 = por %p78_p2, %p77_p0  ;;  %p509_p6 = por %p84_p4, %p83_p3 }
   0xf   : > { %p107_p7 = scmp.eq.s32.totalorder %s487_s0, 1  ;;  %p113_p8 = scmp.eq.s32.totalorder %s284_s1, 1 }
  0x10   : > { %p308_p10 = scmp.lt.s32.totalorder %s438_s19, 2  ;;  %s139_s28 = sand.u32 1, %s434_s18  }
  0x11   : > { %p516_p11 = por %p107_p7, %p77_p0  ;;  %p520_p12 = por %p113_p8, %p83_p3 }
  0x12   : > { %s288_s29 = sshll.u32 %s438_s19, 3  ;;  %s287_s30 = sshll.u32 %s139_s28, 3 }
  0x13   : > { %s147_s6 = scalar_lea.hbm %s595_s2, %s288_s29  ;;  %s143_s8 = scalar_lea.vmem [#allocation4], %s287_s30 }
  0x14   : > { %s149_s7 = sshll.u32 %s147_s6, 4  ;;  %s151_s9 = sshll.u32 %s143_s8, 4  ;;  %s150_s7 = int_to_ptr.hbm [resolvable:$true] %s149_s7  ;;  %s152_s9 = int_to_ptr.vmem [resolvable:$true] %s151_s9 }
  0x15   : > { %p531_p13 = pnand %p308_p10, %p505_p5  ;;  %p289_p0 = scmp.ge.s32.totalorder %s438_s19, 1 }
  0x16   : > { %p156_p1 = scmp.lt.s32.totalorder %s438_s19, 3  ;;  %s140_s11 = scalar_lea.sflag [#allocation5], %s139_s28 }
  0x17   : > { %s342_s12 = sshra.s32 %s150_s7, 4  ;;  %p346_p3 = pneg %p531_p13  ;;  %s343_s12 = int_to_ptr.hbm [resolvable:$true] %s342_s12 }
  0x18   : > { %s344_s13 = scalar_lea.hbm %s343_s12, 8  ;;  %s349_s1 = scalar_lea.hbm %s595_s2, 16 }
  0x19   : > { %p345_p2 = scmp.ne.s32.totalorder %s343_s12, %s344_s13  ;;  %p350_p5 = scmp.lt.s32.totalorder %s343_s12, %s595_s2 }
  0x1a   : > { %p351_p8 = scmp.lt.s32.totalorder %s349_s1, %s344_s13 }
  0x1b   : > { %p347_p4 = pnand %p346_p3, %p345_p2 }
  0x1c   : > { %p352_p10 = por %p351_p8, %p350_p5 }
  0x1d   : > { %p348_p7 = pneg %p347_p4 }
  0x1f   : > { %p353_p9 = pnand %p352_p10, %p348_p7 }
  0x21   : > { %356 = shalt.err (!%p353_p9)
}
  0x22   : > { %303 = dma.hbm_to_vmem [thread:$0]  (!%p531_p13), %s150_s7, 128, %s152_s9, %s140_s11  }
  0x23   : > { %p157_p2 = pnand %p289_p0, %p156_p1 }
  0x24   : > { %s552_s24 = sand.u32 (!%p157_p2), 1, %s430_s17  }
  0x25   : > { %160 = sbr.rel (%p157_p2) target bundleno = 59 (0x3b), region = 32  ;;  %s290_s28 = sshll.u32 (!%p157_p2), %s552_s24, 3 }
  0x26   : > { %s163_s29 = scalar_lea.sflag (!%p157_p2), [#allocation5], %s552_s24  ;;  %s166_s30 = scalar_lea.vmem (!%p157_p2), [#allocation4], %s290_s28 }
  0x2a   : > { %417 = dma.done.wait (%p509_p6), %s163_s29, 128  }
  0x2b   : > { %419 = vsyncadd (%p509_p6), %s163_s29, 4294967168  ;;  %s191_s4 = sld [smem:[#allocation2]]  ;;  %s293_s6 = sshll.u32 %s487_s0, 3  ;;  %v190_v0 = vld [vmem:[%s166_s30] sm:$0xff] }
  0x2c   : > { %s192_s5 = sld [smem:[#allocation3]]  ;;  %s209_s9 = scalar_lea.hbm %s596_s3, %s293_s6 }
  0x2d   : > { %s189_s10 = scalar_lea.vmem [#allocation7], %s290_s28  ;;  %s213_s12 = sshll.u32 %s209_s9, 4  ;;  %s214_s12 = int_to_ptr.hbm [resolvable:$true] %s213_s12 }
  0x2e   : > { %s211_s11 = sshll.u32 %s189_s10, 4  ;;  %s199_s25 = scalar_lea.sflag [#allocation6], %s552_s24  ;;  %s212_s11 = int_to_ptr.vmem [resolvable:$true] %s211_s11 }
  0x2f   : > { %s386_s13 = sshra.s32 %s214_s12, 4  ;;  %s392_s1 = scalar_lea.hbm %s596_s3, 16  ;;  %s387_s13 = int_to_ptr.hbm [resolvable:$true] %s386_s13 }
  0x30   : > { %s388_s0 = scalar_lea.hbm %s387_s13, 8  ;;  %p393_p0 = scmp.lt.s32.totalorder %s387_s13, %s596_s3 }
  0x31   : > { %v195_v2 = vstv %s191_s4  ;;  %p389_p6 = scmp.ne.s32.totalorder %s387_s13, %s388_s0  ;;  %p394_p1 = scmp.lt.s32.totalorder %s392_s1, %s388_s0 }
  0x32   : > { %v193_v1 = vstv %s192_s5 }
  0x33   : > { %v194_v3 = vmul.f32 %v193_v1, %v190_v0  ;;  %p390_p9 = pnand %p389_p6, %p516_p11  ;;  %p395_p3 = por %p394_p1, %p393_p0 }
  0x35   : > { %v196_v4 = vadd.f32 %v195_v2, %v194_v3  ;;  %p391_p13 = pneg %p390_p9 }
  0x37   : > { %197 = vst [vmem:[%s189_s10] sm:$0xff] %v196_v4  ;;  %p396_p4 = pnand %p395_p3, %p391_p13 }
  0x39   : > { %399 = shalt.err (!%p396_p4)
}
  0x3a   : > { %298 = dma.vmem_to_hbm [thread:$0]  (%p516_p11), %s212_s11, 128, %s214_s12, %s199_s25  }
  0x3b PF: > { %s225_s24 = sand.u32 1, %s426_s16   ;;  %p602_p7 = scmp.ge.s32.totalorder %s438_s19, 2 }
  0x3c   : > { %s226_s28 = scalar_lea.sflag [#allocation6], %s225_s24 }
  0x3d   : > { %p305_p5 = pnand %p602_p7, %p520_p12 }
  0x3f   : > { %p306_p8 = pneg %p305_p5 }
  0x41   : > { %421 = dma.done.wait (%p306_p8), %s226_s28, 128  }
  0x42   : > { %423 = vsyncadd (%p306_p8), %s226_s28, 4294967168  ;;  %p18_p10 = scmp.ge.s32.totalorder %s491_s20, 4   ;;  %s603_s16 = smov %s430_s17 }
  0x43   : > { %s604_s17 = smov %s434_s18  ;;  %s605_s18 = smov %s503_s23 }
  0x44   : > { %s606_s19 = smov %s491_s20  ;;  %20 = sbr.rel (!%p18_p10) target bundleno = 8 (0x8), region = 77 }
  0x49   :  { %232 = vsyncpa [#allocation5], 1 }
  0x4a   :  { %234 = vsyncpa [#allocation5 + $0x1], 1 }
  0x4b   :  { %235 = vsyncpa [#allocation6], 1 }
  0x4c   :  { %237 = vsyncpa [#allocation6 + $0x1], 1 }

</bundles_post_ra>
